<compile_context>
chip_gen: v7x
topology: tpu7x:2x2x1
jax: 0.10.0
libtpu: 0.0.40
codegen_flags: <defaults>
</compile_context>

<pallas_src>
import functools

import jax
import jax.numpy as jnp
from jax import lax
from jax.experimental import pallas as pl
from jax.experimental.pallas import tpu as pltpu


# ----------------------------------------------------------------------------
# Pallas kernel
# ----------------------------------------------------------------------------
def _conv_block_kernel(x_ref, w_ref, scale_ref, shift_ref, border_ref, *rest,
                       Cin_p, W, lanes, co_tile, n_co, is_residual, fuse_pool):
    """Fused 3x3 conv + (bias+BN) affine + ReLU (+ residual | + 2x2 maxpool).

    One grid step = one batch tile x one Cout tile.
      x_ref:      (1, Cin_p, lanes)      lanes = nb*H*W (batch folded in lanes)
      w_ref:      (co_tile, 9*Cin_p)     3x3 taps folded into K
      scale_ref:  (co_tile, 1)           BN scale (ones if no BN)
      shift_ref:  (co_tile, 1)           BN shift with conv bias folded in
      border_ref: (8, lanes)             hoisted 0/1 masks for non-center taps
      [sel_ref:   (lanes, nb*Ho*Wo)]     0/1 pool-selection matrix (fuse_pool)
      o_ref:      (1, co_tile, lanes) or (1, co_tile, nb*Ho*Wo)
      patch_ref:  (9*Cin_p, lanes)       VMEM scratch, built once per batch tile
    """
    if fuse_pool:
        sel_ref, o_ref, patch_ref = rest
    else:
        o_ref, patch_ref = rest

    mxu_dt = w_ref.dtype
    j = pl.program_id(1)

    # Build the im2col patch matrix once per batch tile (reused across Cout
    # tiles): XLU rolls along the flat lane axis + resident 0/1 border masks.
    # Each tap goes straight into the scratch, so only one tap is live at once.
    @pl.when(j == 0)
    def _build_patches():
        x_m = x_ref[0].astype(mxu_dt)                       # (Cin_p, lanes)
        mi = 0
        for dy in range(3):
            for dx in range(3):
                t = dy * 3 + dx
                if dy == 1 and dx == 1:
                    tap = x_m                               # center tap
                else:
                    off = (dy - 1) * W + (dx - 1)
                    rolled = pltpu.roll(x_m, (-off) % lanes, axis=1)
                    tap = rolled * border_ref[mi:mi + 1, :]
                    mi += 1
                patch_ref[t * Cin_p:(t + 1) * Cin_p, :] = tap

    # One fat MXU matmul: (co_tile, 9*Cin_p) @ (9*Cin_p, lanes) -> f32.
    acc = jnp.dot(w_ref[...], patch_ref[...],
                  preferred_element_type=jnp.float32)

    # Folded conv-bias + BatchNorm affine, then ReLU (f32, lane-dense).
    y = acc * scale_ref[...] + shift_ref[...]
    y = jnp.maximum(y, 0.0)

    if is_residual:
        # skip connection: out = out + x (Cin == Cout), matching channel rows.
        if n_co == 1:
            skip = x_ref[0, :co_tile, :]
        else:
            start = pl.multiple_of(j * co_tile, co_tile)
            skip = x_ref[0, pl.ds(start, co_tile), :]
        y = y + skip.astype(jnp.float32)

    if fuse_pool:
        # Fused MaxPool2d(2,2): lane rolls bring in the (+1, +W, +W+1)
        # neighbours; a small 0/1 selection matmul (mxu dtype) gathers the even
        # window origins into a lane-dense (co_tile, nb*Ho*Wo) slab.  Cross-
        # image wrap only pollutes non-origin lanes (W, H are even).
        m = jnp.maximum(y, pltpu.roll(y, lanes - 1, axis=1))
        m = jnp.maximum(m, pltpu.roll(m, lanes - W, axis=1))
        y = jnp.dot(m.astype(mxu_dt), sel_ref[...],
                    preferred_element_type=jnp.float32)

    o_ref[...] = y[None].astype(o_ref.dtype)


# ----------------------------------------------------------------------------
# Wrapper
# ----------------------------------------------------------------------------
_MAX_LANES = 2048               # lane-axis block width budget (batch tiling)
_SEL_BUDGET_BYTES = 2 << 20     # keep the pool-selection matrix small


def conv_block_pallas(x_nchw, w_hwio, b, gamma, beta, mean, var, *,
                      use_bn, use_skip_connection, use_maxpool, eps=1e-5,
                      mxu_dtype=None, co_tile=None):
    N, Cin, H, W = x_nchw.shape
    Cout = w_hwio.shape[-1]
    HW = H * W
    is_residual = use_skip_connection and Cin == Cout
    do_pool = (not is_residual) and use_maxpool

    in_dtype = x_nchw.dtype
    if mxu_dtype is None:
        mxu_dtype = in_dtype        # bf16 is a valid perf option on v5e/v6e/v7x
    f32 = jnp.float32
    mxu_bytes = jnp.dtype(mxu_dtype).itemsize

    # Fold the conv bias into the (reparametrized) BN inference affine.
    if use_bn:
        scale = gamma.astype(f32) * lax.rsqrt(var.astype(f32) + eps)
        shift = beta.astype(f32) + (b.astype(f32) - mean.astype(f32)) * scale
    else:
        scale = jnp.ones((Cout,), f32)
        shift = b.astype(f32)
    scale = scale.reshape(Cout, 1)
    shift = shift.reshape(Cout, 1)

    # Fold the batch into the lane axis: lanes = nb*H*W per grid step.
    nb = 1
    for cand in range(N, 0, -1):
        if N % cand == 0 and cand * HW <= _MAX_LANES:
            nb = cand
            break
    lanes = nb * HW
    n_bt = N // nb
    # TODO(synk): for large H*W (image + 9x patch scratch vs 64 MiB VMEM on
    # v7x) add row-tile-with-halo spatial tiling of the lane axis.

    # Pad Cin to a multiple of 8 so every tap block is sublane aligned.
    Cin_p = ((Cin + 7) // 8) * 8
    x_l = x_nchw.reshape(n_bt, nb, Cin, HW).transpose(0, 2, 1, 3)
    x_l = x_l.reshape(n_bt, Cin, lanes)
    if Cin_p != Cin:
        x_l = jnp.pad(x_l, ((0, 0), (0, Cin_p - Cin), (0, 0)))

    w_p = w_hwio
    if Cin_p != Cin:
        w_p = jnp.pad(w_hwio, ((0, 0), (0, 0), (0, Cin_p - Cin), (0, 0)))
    # HWIO (3,3,Cin_p,Cout) -> (Cout, 9*Cin_p): taps folded into K.
    w2 = jnp.transpose(w_p.reshape(9 * Cin_p, Cout)).astype(mxu_dtype)

    # Hoisted 0/1 border masks for the 8 non-center taps (depend only on H,W).
    q = jnp.arange(HW, dtype=jnp.int32)
    py, px = q // W, q % W
    rows = []
    for dy in range(3):
        for dx in range(3):
            if dy == 1 and dx == 1:
                continue
            iy, ix = py + (dy - 1), px + (dx - 1)
            rows.append((iy >= 0) & (iy < H) & (ix >= 0) & (ix < W))
    border = jnp.tile(jnp.stack(rows).astype(mxu_dtype), (1, nb))  # (8, lanes)

    # Cout tiling (residual no longer forces a single tile).
    if co_tile is None:
        co_tile = 256 if Cout % 256 == 0 else Cout
    assert Cout % co_tile == 0
    n_co = Cout // co_tile

    # Fuse the 2x2 max-pool only while the selection matrix stays small.
    fuse_pool = False
    if do_pool:
        assert H % 2 == 0 and W % 2 == 0
        Ho, Wo = H // 2, W // 2
        out_lanes_pool = nb * Ho * Wo
        fuse_pool = lanes * out_lanes_pool * mxu_bytes <= _SEL_BUDGET_BYTES
        # TODO(synk): replace the selection matmul with strided lane gathers
        # when spatial tiling lands (its size is quadratic in the spatial dim).

    in_specs = [
        pl.BlockSpec((1, Cin_p, lanes), lambda i, j: (i, 0, 0)),
        pl.BlockSpec((co_tile, 9 * Cin_p), lambda i, j: (j, 0)),
        pl.BlockSpec((co_tile, 1), lambda i, j: (j, 0)),
        pl.BlockSpec((co_tile, 1), lambda i, j: (j, 0)),
        pl.BlockSpec((8, lanes), lambda i, j: (0, 0)),
    ]
    inputs = [x_l, w2, scale, shift, border]

    if fuse_pool:
        out_lanes = out_lanes_pool
        r = jnp.arange(out_lanes, dtype=jnp.int32)
        n_img, r_loc = r // (Ho * Wo), r % (Ho * Wo)
        target = n_img * HW + 2 * (r_loc // Wo) * W + 2 * (r_loc % Wo)
        sel = (jnp.arange(lanes, dtype=jnp.int32)[:, None] == target[None, :])
        sel = sel.astype(mxu_dtype)                       # (lanes, out_lanes)
        in_specs.append(pl.BlockSpec((lanes, out_lanes), lambda i, j: (0, 0)))
        inputs.append(sel)
    else:
        out_lanes = lanes

    kernel = functools.partial(
        _conv_block_kernel, Cin_p=Cin_p, W=W, lanes=lanes, co_tile=co_tile,
        n_co=n_co, is_residual=is_residual, fuse_pool=fuse_pool)

    out = pl.pallas_call(
        kernel,
        out_shape=jax.ShapeDtypeStruct((n_bt, Cout, out_lanes), in_dtype),
        grid_spec=pltpu.PrefetchScalarGridSpec(
            num_scalar_prefetch=0,
            grid=(n_bt, n_co),
            in_specs=in_specs,
            out_specs=pl.BlockSpec((1, co_tile, out_lanes),
                                   lambda i, j: (i, j, 0)),
            scratch_shapes=[pltpu.VMEM((9 * Cin_p, lanes), mxu_dtype)],
        ),
        compiler_params=pltpu.CompilerParams(
            # Cout axis 'arbitrary' so the patch scratch built at j==0 is
            # reused across Cout tiles; batch-tile axis stays 'parallel'.
            dimension_semantics=("parallel", "arbitrary"),
            # Comfortably under v7x's 64 MiB physical VMEM at these tiles.
            vmem_limit_bytes=32 * 1024 * 1024),
    )(*inputs)

    if fuse_pool:
        out = out.reshape(n_bt, Cout, nb, Ho * Wo).transpose(0, 2, 1, 3)
        return out.reshape(N, Cout, Ho, Wo)
    out = out.reshape(n_bt, Cout, nb, HW).transpose(0, 2, 1, 3)
    out = out.reshape(N, Cout, H, W)
    if do_pool:   # selection matrix exceeded the budget: pool in XLA instead
        out = lax.reduce_window(out, -jnp.inf, lax.max,
                                (1, 1, 2, 2), (1, 1, 2, 2), "VALID")
    return out


# ----------------------------------------------------------------------------
# Pure-JAX reference (for correctness check)
# ----------------------------------------------------------------------------
def conv_block_reference(x_nchw, w_hwio, b, gamma, beta, mean, var, *,
                         use_bn, use_skip_connection, use_maxpool, eps=1e-5):
    Cin, Cout = x_nchw.shape[1], w_hwio.shape[-1]
    is_residual = use_skip_connection and Cin == Cout
    y = lax.conv_general_dilated(
        x_nchw, w_hwio, (1, 1), ((1, 1), (1, 1)),
        dimension_numbers=("NCHW", "HWIO", "NCHW"),
        precision=lax.Precision.HIGHEST)
    y = y + b[None, :, None, None]
    if use_bn:
        scale = gamma * lax.rsqrt(var + eps)
        shift = beta - mean * scale
        y = y * scale[None, :, None, None] + shift[None, :, None, None]
    y = jnp.maximum(y, 0.0)
    if is_residual:
        y = y + x_nchw
    elif use_maxpool:
        y = lax.reduce_window(y, -jnp.inf, lax.max,
                              (1, 1, 2, 2), (1, 1, 2, 2), "VALID")
    return y


# ----------------------------------------------------------------------------
# Demo
# ----------------------------------------------------------------------------
if __name__ == "__main__":
    key = jax.random.PRNGKey(0)
    N, Cin, H, W = 2, 4, 16, 16
    keys = jax.random.split(key, 13)
    x = jax.random.normal(keys[0], (N, Cin, H, W), jnp.float32)

    def make_params(ks, cin, cout):
        w = 0.1 * jax.random.normal(ks[0], (3, 3, cin, cout), jnp.float32)  # HWIO
        b = 0.1 * jax.random.normal(ks[1], (cout,), jnp.float32)
        gamma = 1.0 + 0.1 * jax.random.normal(ks[2], (cout,), jnp.float32)
        beta = 0.1 * jax.random.normal(ks[3], (cout,), jnp.float32)
        mean = 0.1 * jax.random.normal(ks[4], (cout,), jnp.float32)
        var = jnp.abs(jax.random.normal(ks[5], (cout,), jnp.float32)) + 0.5
        return w, b, gamma, beta, mean, var

    # Config 1: in == out with skip connection -> residual path (pool = Identity)
    p1 = make_params(keys[1:7], Cin, Cin)
    cfg1 = dict(use_bn=True, use_skip_connection=True, use_maxpool=True)
    out1 = jax.block_until_ready(conv_block_pallas(x, *p1, **cfg1))
    ref1 = conv_block_reference(x, *p1, **cfg1)
    assert out1.shape == (N, Cin, H, W)
    err1 = float(jnp.max(jnp.abs(out1 - ref1)))
    assert jnp.allclose(out1, ref1, rtol=1e-5, atol=1e-5), f"cfg1 f32 err {err1}"

    # Config 2: channel-expanding block with fused 2x2 max-pool
    Cout2 = 8
    p2 = make_params(keys[7:13], Cin, Cout2)
    cfg2 = dict(use_bn=True, use_skip_connection=False, use_maxpool=True)
    out2 = jax.block_until_ready(conv_block_pallas(x, *p2, **cfg2))
    ref2 = conv_block_reference(x, *p2, **cfg2)
    assert out2.shape == (N, Cout2, H // 2, W // 2)
    err2 = float(jnp.max(jnp.abs(out2 - ref2)))
    assert jnp.allclose(out2, ref2, rtol=1e-5, atol=1e-5), f"cfg2 f32 err {err2}"

    # Config 3: no BN, no pool, no residual (plain conv + bias + ReLU)
    cfg3 = dict(use_bn=False, use_skip_connection=False, use_maxpool=False)
    out3 = jax.block_until_ready(conv_block_pallas(x, *p2, **cfg3))
    ref3 = conv_block_reference(x, *p2, **cfg3)
    assert out3.shape == (N, Cout2, H, W)
    err3 = float(jnp.max(jnp.abs(out3 - ref3)))
    assert jnp.allclose(out3, ref3, rtol=1e-5, atol=1e-5), f"cfg3 f32 err {err3}"

    # bf16 MXU-operand path (perf option on v5e/v6e/v7x): looser tolerance,
    # both the conv and the pool-selection matmuls run bf16xbf16 -> f32.
    out1b = jax.block_until_ready(
        conv_block_pallas(x, *p1, mxu_dtype=jnp.bfloat16, **cfg1))
    out2b = jax.block_until_ready(
        conv_block_pallas(x, *p2, mxu_dtype=jnp.bfloat16, **cfg2))
    assert jnp.allclose(out1b, ref1, rtol=3e-2, atol=3e-2)
    assert jnp.allclose(out2b, ref2, rtol=3e-2, atol=3e-2)

    print("KERNEL_OK")
</pallas_src>

<mosaic_0001>
module attributes {stable_mosaic.version = 11 : i64} {
  func.func @_conv_block_kernel(%arg0: i32, %arg1: i32, %arg2: memref<1x8x512xf32, #tpu.memory_space<vmem>>, %arg3: memref<4x72xf32, #tpu.memory_space<vmem>>, %arg4: memref<4x1xf32, #tpu.memory_space<vmem>>, %arg5: memref<4x1xf32, #tpu.memory_space<vmem>>, %arg6: memref<8x512xf32, #tpu.memory_space<vmem>>, %arg7: memref<1x4x512xf32, #tpu.memory_space<vmem>>, %arg8: memref<72x512xf32, #tpu.memory_space<vmem>>) attributes {dimension_semantics = [#tpu.dimension_semantics<parallel>, #tpu.dimension_semantics<arbitrary>], iteration_bounds = array<i64: 1, 1>, scalar_prefetch = 0 : i64, scratch_operands = 1 : i64, tpu.core_type = #tpu.core_type<tc>, window_params = [{transform_indices = @transform_0, window_bounds = array<i64: 1, 8, 512>}, {transform_indices = @transform_1, window_bounds = array<i64: 4, 72>}, {transform_indices = @transform_2, window_bounds = array<i64: 4, 1>}, {transform_indices = @transform_3, window_bounds = array<i64: 4, 1>}, {pipeline_mode = #tpu.pipeline_mode<synchronous>, transform_indices = @transform_4, window_bounds = array<i64: 8, 512>}, {transform_indices = @transform_5, window_bounds = array<i64: 1, 4, 512>}]} {
    %c0_i32 = arith.constant 0 : i32
    %0 = arith.cmpi eq, %arg1, %c0_i32 : i32
    %1 = arith.extui %0 : i1 to i32
    %c0_i32_0 = arith.constant 0 : i32
    %2 = arith.cmpi ne, %1, %c0_i32_0 : i32
    scf.if %2 {
      %c0_15 = arith.constant 0 : index
      %c0_16 = arith.constant 0 : index
      %c0_17 = arith.constant 0 : index
      %19 = vector.load %arg2[%c0_15, %c0_16, %c0_17] : memref<1x8x512xf32, #tpu.memory_space<vmem>>, vector<1x8x512xf32>
      %20 = vector.shape_cast %19 : vector<1x8x512xf32> to vector<8x512xf32>
      %c17_i32 = arith.constant 17 : i32
      %21 = tpu.dynamic_rotate %20 by %c17_i32 dim 1 : vector<8x512xf32>, i32 -> vector<8x512xf32>
      %c0_18 = arith.constant 0 : index
      %c0_19 = arith.constant 0 : index
      %22 = vector.load %arg6[%c0_18, %c0_19] : memref<8x512xf32, #tpu.memory_space<vmem>>, vector<1x512xf32>
      %23 = vector.broadcast %22 : vector<1x512xf32> to vector<8x512xf32>
      %24 = arith.mulf %21, %23 : vector<8x512xf32>
      %c0_20 = arith.constant 0 : index
      %c0_21 = arith.constant 0 : index
      %25 = vector.load %arg8[%c0_20, %c0_21] : memref<72x512xf32, #tpu.memory_space<vmem>>, vector<8x512xf32>
      tpu.vector_store %arg8[%c0_20, %c0_21], %24 {strides = array<i32>} : memref<72x512xf32, #tpu.memory_space<vmem>>, vector<8x512xf32>,
      %c16_i32 = arith.constant 16 : i32
      %26 = tpu.dynamic_rotate %20 by %c16_i32 dim 1 : vector<8x512xf32>, i32 -> vector<8x512xf32>
      %c1 = arith.constant 1 : index
      %c0_22 = arith.constant 0 : index
      %27 = vector.load %arg6[%c1, %c0_22] : memref<8x512xf32, #tpu.memory_space<vmem>>, vector<1x512xf32>
      %28 = vector.broadcast %27 : vector<1x512xf32> to vector<8x512xf32>
      %29 = arith.mulf %26, %28 : vector<8x512xf32>
      %c8 = arith.constant 8 : index
      %c0_23 = arith.constant 0 : index
      %30 = vector.load %arg8[%c8, %c0_23] : memref<72x512xf32, #tpu.memory_space<vmem>>, vector<8x512xf32>
      tpu.vector_store %arg8[%c8, %c0_23], %29 {strides = array<i32>} : memref<72x512xf32, #tpu.memory_space<vmem>>, vector<8x512xf32>,
      %c15_i32 = arith.constant 15 : i32
      %31 = tpu.dynamic_rotate %20 by %c15_i32 dim 1 : vector<8x512xf32>, i32 -> vector<8x512xf32>
      %c2 = arith.constant 2 : index
      %c0_24 = arith.constant 0 : index
      %32 = vector.load %arg6[%c2, %c0_24] : memref<8x512xf32, #tpu.memory_space<vmem>>, vector<1x512xf32>
      %33 = vector.broadcast %32 : vector<1x512xf32> to vector<8x512xf32>
      %34 = arith.mulf %31, %33 : vector<8x512xf32>
      %c16 = arith.constant 16 : index
      %c0_25 = arith.constant 0 : index
      %35 = vector.load %arg8[%c16, %c0_25] : memref<72x512xf32, #tpu.memory_space<vmem>>, vector<8x512xf32>
      tpu.vector_store %arg8[%c16, %c0_25], %34 {strides = array<i32>} : memref<72x512xf32, #tpu.memory_space<vmem>>, vector<8x512xf32>,
      %c1_i32 = arith.constant 1 : i32
      %36 = tpu.dynamic_rotate %20 by %c1_i32 dim 1 : vector<8x512xf32>, i32 -> vector<8x512xf32>
      %c3 = arith.constant 3 : index
      %c0_26 = arith.constant 0 : index
      %37 = vector.load %arg6[%c3, %c0_26] : memref<8x512xf32, #tpu.memory_space<vmem>>, vector<1x512xf32>
      %38 = vector.broadcast %37 : vector<1x512xf32> to vector<8x512xf32>
      %39 = arith.mulf %36, %38 : vector<8x512xf32>
      %c24 = arith.constant 24 : index
      %c0_27 = arith.constant 0 : index
      %40 = vector.load %arg8[%c24, %c0_27] : memref<72x512xf32, #tpu.memory_space<vmem>>, vector<8x512xf32>
      tpu.vector_store %arg8[%c24, %c0_27], %39 {strides = array<i32>} : memref<72x512xf32, #tpu.memory_space<vmem>>, vector<8x512xf32>,
      %c32 = arith.constant 32 : index
      %c0_28 = arith.constant 0 : index
      %41 = vector.load %arg8[%c32, %c0_28] : memref<72x512xf32, #tpu.memory_space<vmem>>, vector<8x512xf32>
      tpu.vector_store %arg8[%c32, %c0_28], %20 {strides = array<i32>} : memref<72x512xf32, #tpu.memory_space<vmem>>, vector<8x512xf32>,
      %c511_i32 = arith.constant 511 : i32
      %42 = tpu.dynamic_rotate %20 by %c511_i32 dim 1 : vector<8x512xf32>, i32 -> vector<8x512xf32>
      %c4 = arith.constant 4 : index
      %c0_29 = arith.constant 0 : index
      %43 = vector.load %arg6[%c4, %c0_29] : memref<8x512xf32, #tpu.memory_space<vmem>>, vector<1x512xf32>
      %44 = vector.broadcast %43 : vector<1x512xf32> to vector<8x512xf32>
      %45 = arith.mulf %42, %44 : vector<8x512xf32>
      %c40 = arith.constant 40 : index
      %c0_30 = arith.constant 0 : index
      %46 = vector.load %arg8[%c40, %c0_30] : memref<72x512xf32, #tpu.memory_space<vmem>>, vector<8x512xf32>
      tpu.vector_store %arg8[%c40, %c0_30], %45 {strides = array<i32>} : memref<72x512xf32, #tpu.memory_space<vmem>>, vector<8x512xf32>,
      %c497_i32 = arith.constant 497 : i32
      %47 = tpu.dynamic_rotate %20 by %c497_i32 dim 1 : vector<8x512xf32>, i32 -> vector<8x512xf32>
      %c5 = arith.constant 5 : index
      %c0_31 = arith.constant 0 : index
      %48 = vector.load %arg6[%c5, %c0_31] : memref<8x512xf32, #tpu.memory_space<vmem>>, vector<1x512xf32>
      %49 = vector.broadcast %48 : vector<1x512xf32> to vector<8x512xf32>
      %50 = arith.mulf %47, %49 : vector<8x512xf32>
      %c48 = arith.constant 48 : index
      %c0_32 = arith.constant 0 : index
      %51 = vector.load %arg8[%c48, %c0_32] : memref<72x512xf32, #tpu.memory_space<vmem>>, vector<8x512xf32>
      tpu.vector_store %arg8[%c48, %c0_32], %50 {strides = array<i32>} : memref<72x512xf32, #tpu.memory_space<vmem>>, vector<8x512xf32>,
      %c496_i32 = arith.constant 496 : i32
      %52 = tpu.dynamic_rotate %20 by %c496_i32 dim 1 : vector<8x512xf32>, i32 -> vector<8x512xf32>
      %c6 = arith.constant 6 : index
      %c0_33 = arith.constant 0 : index
      %53 = vector.load %arg6[%c6, %c0_33] : memref<8x512xf32, #tpu.memory_space<vmem>>, vector<1x512xf32>
      %54 = vector.broadcast %53 : vector<1x512xf32> to vector<8x512xf32>
      %55 = arith.mulf %52, %54 : vector<8x512xf32>
      %c56 = arith.constant 56 : index
      %c0_34 = arith.constant 0 : index
      %56 = vector.load %arg8[%c56, %c0_34] : memref<72x512xf32, #tpu.memory_space<vmem>>, vector<8x512xf32>
      tpu.vector_store %arg8[%c56, %c0_34], %55 {strides = array<i32>} : memref<72x512xf32, #tpu.memory_space<vmem>>, vector<8x512xf32>,
      %c495_i32 = arith.constant 495 : i32
      %57 = tpu.dynamic_rotate %20 by %c495_i32 dim 1 : vector<8x512xf32>, i32 -> vector<8x512xf32>
      %c7 = arith.constant 7 : index
      %c0_35 = arith.constant 0 : index
      %58 = vector.load %arg6[%c7, %c0_35] : memref<8x512xf32, #tpu.memory_space<vmem>>, vector<1x512xf32>
      %59 = vector.broadcast %58 : vector<1x512xf32> to vector<8x512xf32>
      %60 = arith.mulf %57, %59 : vector<8x512xf32>
      %c64 = arith.constant 64 : index
      %c0_36 = arith.constant 0 : index
      %61 = vector.load %arg8[%c64, %c0_36] : memref<72x512xf32, #tpu.memory_space<vmem>>, vector<8x512xf32>
      tpu.vector_store %arg8[%c64, %c0_36], %60 {strides = array<i32>} : memref<72x512xf32, #tpu.memory_space<vmem>>, vector<8x512xf32>,
    } else {
    }
    %c0 = arith.constant 0 : index
    %c0_1 = arith.constant 0 : index
    %3 = vector.load %arg3[%c0, %c0_1] : memref<4x72xf32, #tpu.memory_space<vmem>>, vector<4x72xf32>
    %c0_2 = arith.constant 0 : index
    %c0_3 = arith.constant 0 : index
    %4 = vector.load %arg8[%c0_2, %c0_3] : memref<72x512xf32, #tpu.memory_space<vmem>>, vector<72x512xf32>
    %cst = arith.constant dense<0.000000e+00> : vector<4x512xf32>
    %5 = tpu.matmul %3, %4, %cst {dimension_numbers = #tpu.dot_dimension_numbers<[1], [0], [0], [1], [0, 0, 1, 1], [], []>} : vector<4x72xf32>, vector<72x512xf32>, vector<4x512xf32> -> vector<4x512xf32>
    %c0_4 = arith.constant 0 : index
    %c0_5 = arith.constant 0 : index
    %6 = vector.load %arg4[%c0_4, %c0_5] : memref<4x1xf32, #tpu.memory_space<vmem>>, vector<4x1xf32>
    %7 = vector.broadcast %6 : vector<4x1xf32> to vector<4x512xf32>
    %8 = arith.mulf %5, %7 : vector<4x512xf32>
    %c0_6 = arith.constant 0 : index
    %c0_7 = arith.constant 0 : index
    %9 = vector.load %arg5[%c0_6, %c0_7] : memref<4x1xf32, #tpu.memory_space<vmem>>, vector<4x1xf32>
    %10 = vector.broadcast %9 : vector<4x1xf32> to vector<4x512xf32>
    %11 = arith.addf %8, %10 : vector<4x512xf32>
    %cst_8 = arith.constant 0.000000e+00 : f32
    %12 = vector.broadcast %cst_8 : f32 to vector<4x512xf32>
    %13 = arith.maximumf %11, %12 : vector<4x512xf32>
    %c0_9 = arith.constant 0 : index
    %c0_10 = arith.constant 0 : index
    %c0_11 = arith.constant 0 : index
    %14 = vector.load %arg2[%c0_9, %c0_10, %c0_11] : memref<1x8x512xf32, #tpu.memory_space<vmem>>, vector<1x4x512xf32>
    %15 = vector.shape_cast %14 : vector<1x4x512xf32> to vector<4x512xf32>
    %16 = arith.addf %13, %15 : vector<4x512xf32>
    %17 = vector.shape_cast %16 : vector<4x512xf32> to vector<1x4x512xf32>
    %c0_12 = arith.constant 0 : index
    %c0_13 = arith.constant 0 : index
    %c0_14 = arith.constant 0 : index
    %18 = vector.load %arg7[%c0_12, %c0_13, %c0_14] : memref<1x4x512xf32, #tpu.memory_space<vmem>>, vector<1x4x512xf32>
    tpu.vector_store %arg7[%c0_12, %c0_13, %c0_14], %17 {strides = array<i32>} : memref<1x4x512xf32, #tpu.memory_space<vmem>>, vector<1x4x512xf32>,
    return
  }
  func.func @transform_0(%arg0: i32, %arg1: i32) -> (i32, i32, i32) {
    %c0_i32 = arith.constant 0 : i32
    %c0_i32_0 = arith.constant 0 : i32
    %c0_i32_1 = arith.constant 0 : i32
    return %arg0, %c0_i32, %c0_i32_0 : i32, i32, i32
  }
  func.func @transform_1(%arg0: i32, %arg1: i32) -> (i32, i32) {
    %c0_i32 = arith.constant 0 : i32
    %c0_i32_0 = arith.constant 0 : i32
    return %arg1, %c0_i32 : i32, i32
  }
  func.func @transform_2(%arg0: i32, %arg1: i32) -> (i32, i32) {
    %c0_i32 = arith.constant 0 : i32
    %c0_i32_0 = arith.constant 0 : i32
    return %arg1, %c0_i32 : i32, i32
  }
  func.func @transform_3(%arg0: i32, %arg1: i32) -> (i32, i32) {
    %c0_i32 = arith.constant 0 : i32
    %c0_i32_0 = arith.constant 0 : i32
    return %arg1, %c0_i32 : i32, i32
  }
  func.func @transform_4(%arg0: i32, %arg1: i32) -> (i32, i32) {
    %c0_i32 = arith.constant 0 : i32
    %c0_i32_0 = arith.constant 0 : i32
    %c0_i32_1 = arith.constant 0 : i32
    return %c0_i32, %c0_i32_0 : i32, i32
  }
  func.func @transform_5(%arg0: i32, %arg1: i32) -> (i32, i32, i32) {
    %c0_i32 = arith.constant 0 : i32
    %c0_i32_0 = arith.constant 0 : i32
    return %arg0, %arg1, %c0_i32 : i32, i32, i32
  }
}

</mosaic_0001>

<bundles_post_ra>
// kernel: tpu_custom_call.1
= control target key start
LH: loop header
LB: loop body
LE: loop exit
PB: predicated region body
PF: predicated region fallthrough
CT: control target
= control target key end

     0   :  { %10 = vsyncpa [#allocation4], 0  ;;  %s1002_s0 = inlined_call_operand.hbm [shape: f32[1,8,512], index: 0, kind: input, shape index: {}]   ;;  %s1003_s1 = inlined_call_operand.vmem [shape: f32[4,72], index: 1, kind: input, shape index: {}]   ;;  %s1004_s2 = inlined_call_operand.vmem [shape: f32[4,1], index: 2, kind: input, shape index: {}]   ;;  %s1005_s3 = inlined_call_operand.vmem [shape: f32[4,1], index: 3, kind: input, shape index: {}]   ;;  %s1006_s4 = inlined_call_operand.hbm [shape: f32[8,512], index: 4, kind: input, shape index: {}]   ;;  %s1007_s5 = inlined_call_operand.hbm [shape: f32[1,4,512], index: 5, kind: output, shape index: {}]  }
   0x1   :  { %11 = vsyncpa [#allocation7], 0 }
   0x2   :  { %12 = vsyncpa [#allocation5], 0  ;;  %s772_s18 = smov [#allocation3]   ;;  %s773_s20 = smov [#allocation6]  }
   0x3   :  { %s19_s19 = sshll.u32 %s772_s18, 4  ;;  %s35_s21 = sshll.u32 %s773_s20, 4  ;;  %s20_s19 = int_to_ptr.vmem [resolvable:$true] %s19_s19  ;;  %s36_s21 = int_to_ptr.vmem [resolvable:$true] %s35_s21 }
   0x4   :  { %s700_s24 = scalar_lea.hbm %s1002_s0, 512 }
   0x5   :  { %p701_p0 = scmp.ne.s32.totalorder %s1002_s0, %s700_s24  ;;  %p704_p1 = scmp.lt.u32.totalorder %s700_s24, %s1002_s0 }
   0x7   :  { %p706_p2 = pnand %p704_p1, %p701_p0 }
   0x9   :  { %709 = shalt.err (!%p706_p2)
}
   0xa   :  { %s710_s29 = scalar_lea.vmem %s20_s19, 512  ;;  %p715_p4 = scmp.lt.s32.totalorder %s20_s19, %s20_s19 }
   0xb   :  { %p711_p3 = scmp.ne.s32.totalorder %s20_s19, %s710_s29  ;;  %p716_p5 = scmp.lt.s32.totalorder %s710_s29, %s710_s29 }
   0xd   :  { %p717_p6 = por %p716_p5, %p715_p4 }
   0xf   :  { %p718_p7 = pnand %p717_p6, %p711_p3 }
  0x11   :  { %721 = shalt.err (!%p718_p7)
}
  0x12   :  { %22 = dma.hbm_to_vmem [thread:$0]  %s1002_s0, 512, %s20_s19, [#allocation4]  }
  0x13   :  { %s722_s9 = scalar_lea.hbm %s1006_s4, 512 }
  0x14   :  { %p723_p8 = scmp.ne.s32.totalorder %s1006_s4, %s722_s9  ;;  %p726_p9 = scmp.lt.u32.totalorder %s722_s9, %s1006_s4 }
  0x16   :  { %p728_p10 = pnand %p726_p9, %p723_p8 }
  0x18   :  { %731 = shalt.err (!%p728_p10)
}
  0x19   :  { %s732_s14 = scalar_lea.vmem %s36_s21, 512  ;;  %p737_p12 = scmp.lt.s32.totalorder %s36_s21, %s36_s21 }
  0x1a   :  { %p733_p11 = scmp.ne.s32.totalorder %s36_s21, %s732_s14  ;;  %p738_p13 = scmp.lt.s32.totalorder %s732_s14, %s732_s14 }
  0x1c   :  { %p739_p0 = por %p738_p13, %p737_p12 }
  0x1e   :  { %p740_p1 = pnand %p739_p0, %p733_p11 }
  0x20   :  { %743 = shalt.err (!%p740_p1)
}
  0x21   :  { %38 = dma.hbm_to_vmem [thread:$0]  %s1006_s4, 512, %s36_s21, [#allocation7]  }
  0x22   :  { %766 = dma.done.wait [#allocation4], 512  }
  0x23   :  { %767 = vsyncadd [#allocation4], 4294966784 }
  0x24   :  { %768 = dma.done.wait [#allocation7], 512  }
  0x25   :  { %769 = vsyncadd [#allocation7], 4294966784  ;;  %v839_v0 = vld [vmem:[#allocation3 + $0x10] sm:$0xff]  ;;  %v841_v1 = vld [vmem:[#allocation3] sm:$0xff]  ;;  %s774_s16 = smov 17   ;;  %s775_s4 = smov 16   ;;  %v61_v8 = vlaneseq }
  0x26   :  { %57 = vrot.lane.b32.xlu1 %v839_v0, %s774_s16  ;;  %53 = vrot.lane.b32.xlu0 %v841_v1, %s774_s16  ;;  %v845_v2 = vld [vmem:[#allocation3 + $0x18] sm:$0xff]  ;;  %v847_v3 = vld [vmem:[#allocation3 + $0x8] sm:$0xff]  ;;  %s776_s17 = smov 15   ;;  %s777_s18 = smov 1   ;;  %v781_v4 = vmov 0.0   ;;  %v782_v5 = vmov 0  }
  0x27   :  { %s778_s19 = smov 127   ;;  %s779_s20 = smov 113   ;;  %515 = vmatprep.mubr.f32.mxu0 %v781_v4  ;;  %586 = vmatprep.mubr.f32.mxu1 %v781_v4  ;;  %v593_v6 = vld [vmem:[%s1004_s2] sm:$0xf]  ;;  %v71_v9 = vshrl.u32 %v61_v8, 7  ;;  %v885_v12 = vand.u32 127, %v61_v8 }
  0x28   :  { %s780_s21 = smov 112   ;;  %698 = vset.pattern.permute.xlu0 %v782_v5  ;;  %699 = vset.pattern.permute.xlu1 %v782_v5  ;;  %s783_s22 = smov 111   ;;  %v603_v7 = vld [vmem:[%s1005_s3] sm:$0xf]  ;;  %vm447_vm8 = vcmask 588800  }
  0x29   :  { %v887_v13 = vsub.s32 1, %v71_v9  ;;  %v68_v14 = vld [vmem:[#allocation6] ss:$8 sm:$0xf]  ;;  %vm63_vm0 = vcmp.lt.s32.totalorder %v885_v12, 17  ;;  %v890_v16 = vsub.s32 0, %v71_v9 }
  0x2a   :  { %59 = vrot.lane.b32.xlu1 %v845_v2, %s774_s16  ;;  %55 = vrot.lane.b32.xlu0 %v847_v3, %s774_s16  ;;  %v112_v15 = vld [vmem:[#allocation6 + $0x1] ss:$8 sm:$0xf]  ;;  %v892_v18 = vsub.s32 2, %v71_v9  ;;  %v894_v20 = vsub.s32 3, %v71_v9  ;;  %vm106_vm1 = vcmp.lt.s32.totalorder %v885_v12, 16 }
  0x2b   :  { %v77_v21 = vrot.slane %v68_v14, %v887_v13  ;;  %v121_v22 = vrot.slane %v112_v15, %v887_v13  ;;  %v73_v24 = vrot.slane %v68_v14, %v890_v16  ;;  %v117_v31 = vrot.slane %v112_v15, %v890_v16  ;;  %v156_v55 = vld [vmem:[#allocation6 + $0x2] ss:$8 sm:$0xf]  ;;  %v200_v56 = vld [vmem:[#allocation6 + $0x3] ss:$8 sm:$0xf] }
  0x2c   :  { %v81_v25 = vrot.slane %v68_v14, %v892_v18  ;;  %v85_v28 = vrot.slane %v68_v14, %v894_v20  ;;  %v125_v32 = vrot.slane %v112_v15, %v892_v18  ;;  %v129_v36 = vrot.slane %v112_v15, %v894_v20 }
  0x2d   :  { %vm150_vm2 = vcmp.lt.s32.totalorder %v885_v12, 15  ;;  %v165_v59 = vrot.slane %v156_v55, %v887_v13  ;;  %vm194_vm3 = vcmp.lt.s32.totalorder %v885_v12, 1  ;;  %v209_v60 = vrot.slane %v200_v56, %v887_v13 }
  0x2e   :  { %100 = vrot.lane.b32.xlu1 %v847_v3, %s775_s4  ;;  %98 = vrot.lane.b32.xlu0 %v841_v1, %s775_s4  ;;  %v161_v62 = vrot.slane %v156_v55, %v890_v16  ;;  %v169_v63 = vrot.slane %v156_v55, %v892_v18  ;;  %v173_v4 = vrot.slane %v156_v55, %v894_v20  ;;  %vm242_vm4 = vcmp.lt.s32.totalorder %v885_v12, 127 }
  0x2f   :  { %v205_v9 = vrot.slane %v200_v56, %v890_v16  ;;  %vm330_vm5 = vcmp.lt.s32.totalorder %v885_v12, 112  ;;  %vm286_vm6 = vcmp.lt.s32.totalorder %v885_v12, 113  ;;  %vm374_vm7 = vcmp.lt.s32.totalorder %v885_v12, 111 }
  0x32   :  { %104 = vrot.lane.b32.xlu1 %v845_v2, %s775_s4  ;;  %102 = vrot.lane.b32.xlu0 %v839_v0, %s775_s4 }
  0x36   :  { %144 = vrot.lane.b32.xlu1 %v847_v3, %s776_s17  ;;  %142 = vrot.lane.b32.xlu0 %v841_v1, %s776_s17 }
  0x3a   :  { %148 = vrot.lane.b32.xlu1 %v845_v2, %s776_s17  ;;  %146 = vrot.lane.b32.xlu0 %v839_v0, %s776_s17 }
  0x3e   :  { %188 = vrot.lane.b32.xlu1 %v847_v3, %s777_s18  ;;  %186 = vrot.lane.b32.xlu0 %v841_v1, %s777_s18 }
  0x42   :  { %192 = vrot.lane.b32.xlu1 %v845_v2, %s777_s18  ;;  %190 = vrot.lane.b32.xlu0 %v839_v0, %s777_s18 }
  0x46   :  { %236 = vrot.lane.b32.xlu1 %v847_v3, %s778_s19  ;;  %234 = vrot.lane.b32.xlu0 %v841_v1, %s778_s19 }
  0x4a   :  { %240 = vrot.lane.b32.xlu1 %v845_v2, %s778_s19  ;;  %238 = vrot.lane.b32.xlu0 %v839_v0, %s778_s19 }
  0x4e   :  { %280 = vrot.lane.b32.xlu1 %v847_v3, %s779_s20  ;;  %278 = vrot.lane.b32.xlu0 %v841_v1, %s779_s20 }
  0x52   :  { %284 = vrot.lane.b32.xlu1 %v845_v2, %s779_s20  ;;  %282 = vrot.lane.b32.xlu0 %v839_v0, %s779_s20 }
  0x56   :  { %324 = vrot.lane.b32.xlu1 %v847_v3, %s780_s21  ;;  %322 = vrot.lane.b32.xlu0 %v841_v1, %s780_s21 }
  0x5a   :  { %328 = vrot.lane.b32.xlu1 %v845_v2, %s780_s21  ;;  %326 = vrot.lane.b32.xlu0 %v839_v0, %s780_s21 }
  0x5e   :  { %368 = vrot.lane.b32.xlu1 %v847_v3, %s783_s22  ;;  %366 = vrot.lane.b32.xlu0 %v841_v1, %s783_s22 }
  0x62   :  { %372 = vrot.lane.b32.xlu1 %v845_v2, %s783_s22  ;;  %370 = vrot.lane.b32.xlu0 %v839_v0, %s783_s22 }
  0x66   :  { %596 = vperm.xlu0 %698, %v593_v6   ;;  %606 = vperm.xlu1 %699, %v603_v7  }
  0x98   :  { %v58_v10 = vpop.permute.xlu1 %57  ;;  %v54_v11 = vpop.permute.xlu0 %53 }
  0x9c   :  { %v60_v17 = vpop.permute.xlu1 %59  ;;  %v56_v19 = vpop.permute.xlu0 %55 }
  0x9d   :  { %v66_v23 = vsel %vm63_vm0, %v54_v11, %v56_v19  ;;  %v67_v29 = vsel %vm63_vm0, %v60_v17, %v54_v11  ;;  %v65_v33 = vsel %vm63_vm0, %v56_v19, %v58_v10  ;;  %v64_v37 = vsel %vm63_vm0, %v58_v10, %v60_v17 }
  0x9e   :  { %v91_v34 = vmul.f32 %v77_v21, %v66_v23  ;;  %v90_v38 = vmul.f32 %v73_v24, %v67_v29  ;;  %v92_v42 = vmul.f32 %v81_v25, %v65_v33  ;;  %v93_v48 = vmul.f32 %v85_v28, %v64_v37  ;;  %v248_v33 = vld [vmem:[#allocation6 + $0x4] ss:$8 sm:$0xf] }
  0x9f   :  { %v213_v10 = vrot.slane %v200_v56, %v892_v18  ;;  %v217_v17 = vrot.slane %v200_v56, %v894_v20 }
  0xa0   :  { %v101_v26 = vpop.permute.xlu1 %100  ;;  %v99_v27 = vpop.permute.xlu0 %98 }
  0xa1   :  { %v109_v30 = vsel %vm106_vm1, %v99_v27, %v101_v26 }
  0xa2   :  { %v135_v35 = vmul.f32 %v121_v22, %v109_v30 }
  0xa4   :  { %v105_v39 = vpop.permute.xlu1 %104  ;;  %v103_v40 = vpop.permute.xlu0 %102  ;;  %v653_v41 = vpack.c.bf16 %v135_v35, %v91_v34 }
  0xa5   :  { %v110_v43 = vsel %vm106_vm1, %v105_v39, %v99_v27  ;;  %v107_v44 = vsel %vm106_vm1, %v103_v40, %v105_v39  ;;  %v108_v45 = vsel %vm106_vm1, %v101_v26, %v103_v40  ;;  %v253_v39 = vrot.slane %v248_v33, %v890_v16 }
  0xa6   :  { %v134_v46 = vmul.f32 %v117_v31, %v110_v43  ;;  %v136_v47 = vmul.f32 %v125_v32, %v108_v45  ;;  %654 = vmatprep.subr.bf16.mxu0 %v653_v41  ;;  %v137_v49 = vmul.f32 %v129_v36, %v107_v44  ;;  %v265_v40 = vrot.slane %v248_v33, %v894_v20 }
  0xa7   :  { %v261_v43 = vrot.slane %v248_v33, %v892_v18 }
  0xa8   :  { %v145_v50 = vpop.permute.xlu1 %144  ;;  %v143_v51 = vpop.permute.xlu0 %142  ;;  %v655_v52 = vpack.c.bf16 %v134_v46, %v90_v38  ;;  %v669_v53 = vpack.c.bf16 %v137_v49, %v93_v48  ;;  %v671_v54 = vpack.c.bf16 %v136_v47, %v92_v42  ;;  %v257_v42 = vrot.slane %v248_v33, %v887_v13  ;;  %v380_v33 = vld [vmem:[#allocation6 + $0x7] ss:$8 sm:$0xf] }
  0xa9   :  { %v153_v61 = vsel %vm150_vm2, %v143_v51, %v145_v50 }
  0xaa   :  { %656 = vmatpush1.bf16.msra.mxu0 %v655_v52  ;;  %670 = vmatprep.subr.bf16.mxu1 %v669_v53  ;;  %v179_v11 = vmul.f32 %v165_v59, %v153_v61  ;;  %v336_v61 = vld [vmem:[#allocation6 + $0x6] ss:$8 sm:$0xf] }
  0xab   :  { %672 = vmatpush1.bf16.msra.mxu1 %v671_v54 }
  0xac   :  { %v149_v57 = vpop.permute.xlu1 %148  ;;  %v147_v58 = vpop.permute.xlu0 %146 }
  0xad   :  { %v154_v7 = vsel %vm150_vm2, %v149_v57, %v143_v51  ;;  %v152_v14 = vsel %vm150_vm2, %v145_v50, %v147_v58  ;;  %v151_v19 = vsel %vm150_vm2, %v147_v58, %v149_v57 }
  0xae   :  { %v178_v21 = vmul.f32 %v161_v62, %v154_v7  ;;  %v180_v25 = vmul.f32 %v169_v63, %v152_v14  ;;  %v181_v29 = vmul.f32 %v173_v4, %v151_v19  ;;  %v292_v62 = vld [vmem:[#allocation6 + $0x5] ss:$8 sm:$0xf] }
  0xb0   :  { %v189_v5 = vpop.permute.xlu1 %188  ;;  %v187_v6 = vpop.permute.xlu0 %186 }
  0xb1   :  { %v197_v8 = vsel %vm194_vm3, %v187_v6, %v189_v5 }
  0xb2   :  { %v223_v15 = vmul.f32 %v209_v60, %v197_v8  ;;  %v353_v8 = vrot.slane %v336_v61, %v894_v20 }
  0xb4   :  { %v193_v22 = vpop.permute.xlu1 %192  ;;  %v191_v23 = vpop.permute.xlu0 %190  ;;  %v657_v24 = vpack.c.bf16 %v223_v15, %v179_v11  ;;  %v297_v11 = vrot.slane %v292_v62, %v890_v16 }
  0xb5   :  { %v198_v26 = vsel %vm194_vm3, %v193_v22, %v187_v6  ;;  %v195_v27 = vsel %vm194_vm3, %v191_v23, %v193_v22  ;;  %v196_v28 = vsel %vm194_vm3, %v189_v5, %v191_v23  ;;  %v341_v6 = vrot.slane %v336_v61, %v890_v16 }
  0xb6   :  { %v222_v30 = vmul.f32 %v205_v9, %v198_v26  ;;  %v224_v31 = vmul.f32 %v213_v10, %v196_v28  ;;  %v225_v32 = vmul.f32 %v217_v17, %v195_v27  ;;  %658 = vmatprep.subr.bf16.mxu0 %v657_v24  ;;  %v345_v9 = vrot.slane %v336_v61, %v887_v13 }
  0xb7   :  { %v349_v10 = vrot.slane %v336_v61, %v892_v18  ;;  %v617_v61 = vld [vmem:[#allocation3] sm:$0xf] }
  0xb8   :  { %v237_v34 = vpop.permute.xlu1 %236  ;;  %v235_v35 = vpop.permute.xlu0 %234  ;;  %v659_v36 = vpack.c.bf16 %v222_v30, %v178_v21  ;;  %v673_v37 = vpack.c.bf16 %v225_v32, %v181_v29  ;;  %v675_v38 = vpack.c.bf16 %v224_v31, %v180_v25 }
  0xb9   :  { %v245_v41 = vsel %vm242_vm4, %v235_v35, %v237_v34 }
  0xba   :  { %660 = vmatpush1.bf16.msra.mxu0 %v659_v36  ;;  %674 = vmatprep.subr.bf16.mxu1 %v673_v37  ;;  %v270_v46 = vmul.f32 %v253_v39, %v245_v41  ;;  %v397_v39 = vrot.slane %v380_v33, %v894_v20  ;;  %v393_v41 = vrot.slane %v380_v33, %v892_v18 }
  0xbb   :  { %676 = vmatpush1.bf16.msra.mxu1 %v675_v38 }
  0xbc   :  { %v241_v44 = vpop.permute.xlu1 %240  ;;  %v239_v45 = vpop.permute.xlu0 %238  ;;  %v663_v58 = vpack.c.bf16 %v270_v46, %v841_v1  ;;  %v305_v1 = vrot.slane %v292_v62, %v892_v18 }
  0xbd   :  { %v246_v47 = vsel %vm242_vm4, %v241_v44, %v235_v35  ;;  %v243_v48 = vsel %vm242_vm4, %v239_v45, %v241_v44  ;;  %v244_v49 = vsel %vm242_vm4, %v237_v34, %v239_v45 }
  0xbe   :  { %v273_v50 = vmul.f32 %v265_v40, %v246_v47  ;;  %v271_v51 = vmul.f32 %v257_v42, %v244_v49  ;;  %v272_v52 = vmul.f32 %v261_v43, %v243_v48  ;;  %v389_v40 = vrot.slane %v380_v33, %v887_v13 }
  0xbf   :  { %v385_v42 = vrot.slane %v380_v33, %v890_v16 }
  0xc0   :  { %v281_v53 = vpop.permute.xlu1 %280  ;;  %v279_v54 = vpop.permute.xlu0 %278  ;;  %v661_v55 = vpack.c.bf16 %v271_v51, %v847_v3  ;;  %v677_v56 = vpack.c.bf16 %v273_v50, %v845_v2  ;;  %v679_v57 = vpack.c.bf16 %v272_v52, %v839_v0  ;;  %v309_v3 = vrot.slane %v292_v62, %v894_v20 }
  0xc1   :  { %v301_v2 = vrot.slane %v292_v62, %v887_v13  ;;  %v289_v15 = vsel %vm286_vm6, %v279_v54, %v281_v53  ;;  %v410_v13 = vld [vmem:[%s1003_s1] sm:$0xf]  ;;  %v619_v62 = vld [vmem:[#allocation3 + $0x10] sm:$0xf]  ;;  %s784_s1 = smov [#allocation8]  }
  0xc2   :  { %662 = vmatprep.subr.bf16.mxu0 %v661_v55  ;;  %678 = vmatprep.subr.bf16.mxu1 %v677_v56  ;;  %v314_v31 = vmul.f32 %v297_v11, %v289_v15  ;;  %s641_s27 = sshll.u32 %s784_s1, 4  ;;  %s642_s27 = int_to_ptr.vmem [resolvable:$true] %s641_s27 }
  0xc3   :  { %664 = vmatpush1.bf16.msra.mxu0 %v663_v58  ;;  %680 = vmatpush1.bf16.msra.mxu1 %v679_v57  ;;  %s744_s28 = scalar_lea.vmem %s642_s27, 256  ;;  %p749_p3 = scmp.lt.s32.totalorder %s642_s27, %s642_s27 }
  0xc4   :  { %v285_v59 = vpop.permute.xlu1 %284  ;;  %v283_v60 = vpop.permute.xlu0 %282  ;;  %p745_p2 = scmp.ne.s32.totalorder %s642_s27, %s744_s28  ;;  %p750_p4 = scmp.lt.s32.totalorder %s744_s28, %s744_s28 }
  0xc5   :  { %v290_v4 = vsel %vm286_vm6, %v285_v59, %v279_v54  ;;  %v288_v5 = vsel %vm286_vm6, %v281_v53, %v283_v60  ;;  %v287_v14 = vsel %vm286_vm6, %v283_v60, %v285_v59 }
  0xc6   :  { %v317_v17 = vmul.f32 %v309_v3, %v290_v4  ;;  %v315_v19 = vmul.f32 %v301_v2, %v288_v5  ;;  %v316_v27 = vmul.f32 %v305_v1, %v287_v14  ;;  %p751_p5 = por %p750_p4, %p749_p3 }
  0xc8   :  { %v325_v63 = vpop.permute.xlu1 %324  ;;  %v323_v0 = vpop.permute.xlu0 %322  ;;  %p752_p6 = pnand %p751_p5, %p745_p2 }
  0xc9   :  { %v333_v7 = vsel %vm330_vm5, %v323_v0, %v325_v63 }
  0xca   :  { %v358_v23 = vmul.f32 %v341_v6, %v333_v7 }
  0xcc   :  { %v329_v21 = vpop.permute.xlu1 %328  ;;  %v327_v22 = vpop.permute.xlu0 %326  ;;  %v667_v38 = vpack.c.bf16 %v358_v23, %v314_v31 }
  0xcd   :  { %v334_v24 = vsel %vm330_vm5, %v329_v21, %v323_v0  ;;  %v331_v25 = vsel %vm330_vm5, %v327_v22, %v329_v21  ;;  %v332_v26 = vsel %vm330_vm5, %v325_v63, %v327_v22  ;;  %v618_v63 = vld [vmem:[#allocation3 + $0x8] sm:$0xf]  ;;  %v620_v0 = vld [vmem:[#allocation3 + $0x18] sm:$0xf] }
  0xce   :  { %v361_v28 = vmul.f32 %v353_v8, %v334_v24  ;;  %v359_v29 = vmul.f32 %v345_v9, %v332_v26  ;;  %v360_v30 = vmul.f32 %v349_v10, %v331_v25 }
  0xd0   :  { %v369_v32 = vpop.permute.xlu1 %368  ;;  %v367_v34 = vpop.permute.xlu0 %366  ;;  %v665_v35 = vpack.c.bf16 %v359_v29, %v315_v19  ;;  %v681_v36 = vpack.c.bf16 %v361_v28, %v317_v17  ;;  %v683_v37 = vpack.c.bf16 %v360_v30, %v316_v27 }
  0xd1   :  { %v377_v43 = vsel %vm374_vm7, %v367_v34, %v369_v32 }
  0xd2   :  { %666 = vmatprep.subr.bf16.mxu0 %v665_v35  ;;  %682 = vmatprep.subr.bf16.mxu1 %v681_v36  ;;  %v402_v51 = vmul.f32 %v385_v42, %v377_v43 }
  0xd3   :  { %668 = vmatpush1.bf16.msra.mxu0 %v667_v38  ;;  %684 = vmatpush1.bf16.msra.mxu1 %v683_v37 }
  0xd4   :  { %v373_v44 = vpop.permute.xlu1 %372  ;;  %v371_v45 = vpop.permute.xlu0 %370 }
  0xd5   :  { %v378_v46 = vsel %vm374_vm7, %v373_v44, %v367_v34  ;;  %v375_v47 = vsel %vm374_vm7, %v371_v45, %v373_v44  ;;  %v376_v48 = vsel %vm374_vm7, %v369_v32, %v371_v45 }
  0xd6   :  { %v405_v12 = vmul.f32 %v397_v39, %v378_v46  ;;  %v403_v49 = vmul.f32 %v389_v40, %v376_v48  ;;  %v404_v50 = vmul.f32 %v393_v41, %v375_v47 }
  0xd8   :  { %467 = vmatprep.subr.mxu0 %v403_v49  ;;  %538 = vmatprep.subr.mxu1 %v405_v12 }
  0xd9   :  { %468 = vmatpush1.msra.mxu0 %v402_v51  ;;  %539 = vmatpush1.msra.mxu1 %v404_v50 }
  0xda   :  { %651 = vmatmul.mubr.msk.f32.vlgmr.msra.gmra.mrb[0].mxu0 %vm447_vm8, %v410_v13  ;;  %652 = vmatmul.mubr.msk.f32.vlgmr.msra.gmra.mrb[0].mxu1 %vm447_vm8, %v410_v13 }
  0xe5   :  { %v597_v16 = vpop.permute.xlu0 %596  ;;  %v607_v18 = vpop.permute.xlu1 %606 }
 0x1ad   :  { %v517_v20 = vpop.f32.mrb[0].mxu0  ;;  %v588_v52 = vpop.f32.mrb[0].mxu1 }
 0x1ae   :  { %v599_v53 = vmul.f32 %v597_v16, %v517_v20  ;;  %v601_v54 = vmul.f32 %v597_v16, %v588_v52  ;;  %v519_v55 = vpop.f32.mrb[1].mxu0  ;;  %v590_v56 = vpop.f32.mrb[1].mxu1 }
 0x1af   :  { %v600_v57 = vmul.f32 %v597_v16, %v519_v55  ;;  %v602_v58 = vmul.f32 %v597_v16, %v590_v56 }
 0x1b0   :  { %v609_v59 = vadd.f32 %v607_v18, %v599_v53  ;;  %v611_v60 = vadd.f32 %v607_v18, %v601_v54 }
 0x1b1   :  { %v610_v3 = vadd.f32 %v607_v18, %v600_v57  ;;  %v612_v2 = vadd.f32 %v607_v18, %v602_v58 }
 0x1b2   :  { %v613_v4 = vmax.f32 %v609_v59, 0.0  ;;  %v615_v1 = vmax.f32 %v611_v60, 0.0 }
 0x1b3   :  { %v614_v5 = vmax.f32 %v610_v3, 0.0  ;;  %v616_v6 = vmax.f32 %v612_v2, 0.0 }
 0x1b4   :  { %v621_v7 = vadd.f32 %v617_v61, %v613_v4  ;;  %v623_v8 = vadd.f32 %v619_v62, %v615_v1 }
 0x1b5   :  { %v622_v9 = vadd.f32 %v618_v63, %v614_v5  ;;  %v624_v10 = vadd.f32 %v620_v0, %v616_v6 }
 0x1b7   :  { %v629_v11 = vcombine.low %v621_v7, %v622_v9  ;;  %v630_v14 = vcombine.low %v623_v8, %v624_v10 }
 0x1b9   :  { %633 = vst [vmem:[#allocation8] sm:$0xff] %v629_v11  ;;  %634 = vst [vmem:[#allocation8 + $0x8] sm:$0xff] %v630_v14 }
 0x1ba   :  { %755 = shalt.err (!%p752_p6)
}
 0x1bb   :  { %s756_s6 = scalar_lea.hbm %s1007_s5, 256 }
 0x1bc   :  { %p757_p7 = scmp.ne.s32.totalorder %s1007_s5, %s756_s6  ;;  %p760_p8 = scmp.lt.u32.totalorder %s756_s6, %s1007_s5 }
 0x1be   :  { %p762_p9 = pnand %p760_p8, %p757_p7 }
 0x1c0   :  { %765 = shalt.err (!%p762_p9)
}
 0x1c1   :  { %644 = dma.vmem_to_hbm [thread:$0]  %s642_s27, 256, %s1007_s5, [#allocation5]  }
 0x1c2   :  { %770 = dma.done.wait [#allocation5], 256  }
 0x1c3   :  { %771 = vsyncadd [#allocation5], 4294967040 }
 0x1c4   :  { %648 = vsyncpa [#allocation4], 1 }
 0x1c5   :  { %649 = vsyncpa [#allocation7], 1 }
 0x1c6   :  { %650 = vsyncpa [#allocation5], 1 }

</bundles_post_ra>
